<compile_context>
chip_gen: v6e
topology: v6e:2x2x1
jax: 0.10.0
libtpu: 0.0.40
codegen_flags: <defaults>
</compile_context>

<pallas_src>
import functools

import jax
import jax.numpy as jnp
from jax.experimental import pallas as pl
from jax.experimental.pallas import tpu as pltpu


_VMEM_LIMIT = 32 * 1024 * 1024       # fits v5e/v6e/v7x scoped-VMEM budgets
_MAX_BLOCK_BYTES = 4 * 1024 * 1024   # per x block; ~2x with double buffering


def _round_up(x, m):
    return ((x + m - 1) // m) * m


def _pick_tile_rows(n_rows, n_spatial):
    """Row-tile size: as large as the VMEM budget allows (multiple of 8),
    shrinking for big spatial dims, and exposing >= 2 grid steps when
    possible so the 'parallel' grid can be sharded across TensorCores."""
    tr = max(8, (_MAX_BLOCK_BYTES // (n_spatial * 4)) // 8 * 8)
    tr = min(tr, 512)
    tr = min(tr, _round_up(n_rows, 8))
    if n_rows > 8 and pl.cdiv(n_rows, tr) < 2:
        tr = max(8, _round_up(pl.cdiv(n_rows, 2), 8))
    return tr


def _global_mean_kernel(x_ref, w_ref, o_ref):
    # x_ref: (tr, S)   w_ref: (1, S)   o_ref: (tr, 1)
    # Weights are pre-normalized (sum to 1), so the area-weighted mean is a
    # single broadcasted multiply (VPU) + lane reduction (XLU). HBM-bound.
    o_ref[...] = jnp.sum(x_ref[...] * w_ref[...], axis=-1, keepdims=True)


def area_weighted_mean(x, area_weights):
    """Area-weighted mean over the last two (lat, lon) dims of x."""
    *lead, H, W = x.shape
    S = H * W
    R = 1
    for d in lead:
        R *= d
    x_flat = x.reshape(R, S)                         # free reshape (contiguous)
    w_norm = (area_weights / jnp.sum(area_weights)).reshape(1, S).astype(x.dtype)

    tr = _pick_tile_rows(R, S)
    grid = (pl.cdiv(R, tr),)
    # Ragged last row tile is fine: out-of-range input rows read unspecified
    # data, but each such row only feeds its own (discarded) output row.
    out = pl.pallas_call(
        _global_mean_kernel,
        out_shape=jax.ShapeDtypeStruct((R, 1), x.dtype),
        grid=grid,
        in_specs=[pl.BlockSpec((tr, S), lambda i: (i, 0)),
                  pl.BlockSpec((1, S), lambda i: (0, 0))],
        out_specs=pl.BlockSpec((tr, 1), lambda i: (i, 0)),
        compiler_params=pltpu.CompilerParams(
            dimension_semantics=("parallel",),
            vmem_limit_bytes=_VMEM_LIMIT),
    )(x_flat, w_norm)
    return out.reshape(tuple(lead))


class GlobalMean:
    """JAX/Pallas port of the PyTorch GlobalMean module.

    forward(x) = area_weighted_mean(x), removing the horizontal dims."""

    def __init__(self, area_weighted_mean_fn):
        self._area_weighted_mean = area_weighted_mean_fn

    def __call__(self, x):
        return self._area_weighted_mean(x)


if __name__ == "__main__":
    # (n_samples, n_timesteps, n_channels, n_lat, n_lon)
    N, T, C, H, W = 2, 3, 4, 16, 16

    key = jax.random.PRNGKey(0)
    x = jax.random.normal(key, (N, T, C, H, W), jnp.float32)

    # Standard lat-lon area weights: cos(latitude), broadcast over longitude.
    lats = jnp.linspace(-jnp.pi / 2 + jnp.pi / (2 * H),
                        jnp.pi / 2 - jnp.pi / (2 * H), H)
    weights = jnp.broadcast_to(jnp.cos(lats)[:, None], (H, W)).astype(jnp.float32)

    global_mean = GlobalMean(
        functools.partial(area_weighted_mean, area_weights=weights))

    out = jax.block_until_ready(global_mean(x))

    # Pure-JAX reference.
    ref = jnp.sum(x * weights, axis=(-2, -1)) / jnp.sum(weights)

    assert out.shape == (N, T, C)
    assert bool(jnp.all(jnp.isfinite(out)))
    assert bool(jnp.allclose(out, ref, rtol=1e-5, atol=1e-5))
    print("KERNEL_OK")
</pallas_src>

<mosaic_0001>
module attributes {stable_mosaic.version = 11 : i64} {
  func.func @_global_mean_kernel(%arg0: i32, %arg1: memref<16x256xf32, #tpu.memory_space<vmem>>, %arg2: memref<1x256xf32, #tpu.memory_space<vmem>>, %arg3: memref<16x1xf32, #tpu.memory_space<vmem>>) attributes {dimension_semantics = [#tpu.dimension_semantics<parallel>], iteration_bounds = array<i64: 2>, scalar_prefetch = 0 : i64, scratch_operands = 0 : i64, tpu.core_type = #tpu.core_type<tc>, window_params = [{transform_indices = @transform_0, window_bounds = array<i64: 16, 256>}, {pipeline_mode = #tpu.pipeline_mode<synchronous>, transform_indices = @transform_1, window_bounds = array<i64: 1, 256>}, {transform_indices = @transform_2, window_bounds = array<i64: 16, 1>}]} {
    %c0 = arith.constant 0 : index
    %c0_0 = arith.constant 0 : index
    %0 = vector.load %arg1[%c0, %c0_0] : memref<16x256xf32, #tpu.memory_space<vmem>>, vector<16x256xf32>
    %c0_1 = arith.constant 0 : index
    %c0_2 = arith.constant 0 : index
    %1 = vector.load %arg2[%c0_1, %c0_2] : memref<1x256xf32, #tpu.memory_space<vmem>>, vector<1x256xf32>
    %2 = vector.broadcast %1 : vector<1x256xf32> to vector<16x256xf32>
    %3 = arith.mulf %0, %2 : vector<16x256xf32>
    %cst = arith.constant dense<0.000000e+00> : vector<16xf32>
    %4 = vector.multi_reduction <add>, %3, %cst [1] : vector<16x256xf32> to vector<16xf32>
    %5 = vector.shape_cast %4 : vector<16xf32> to vector<16x1xf32>
    %c0_3 = arith.constant 0 : index
    %c0_4 = arith.constant 0 : index
    %6 = vector.load %arg3[%c0_3, %c0_4] : memref<16x1xf32, #tpu.memory_space<vmem>>, vector<16x1xf32>
    tpu.vector_store %arg3[%c0_3, %c0_4], %5 {strides = array<i32>} : memref<16x1xf32, #tpu.memory_space<vmem>>, vector<16x1xf32>,
    return
  }
  func.func @transform_0(%arg0: i32) -> (i32, i32) {
    %c0_i32 = arith.constant 0 : i32
    %c0_i32_0 = arith.constant 0 : i32
    return %arg0, %c0_i32 : i32, i32
  }
  func.func @transform_1(%arg0: i32) -> (i32, i32) {
    %c0_i32 = arith.constant 0 : i32
    %c0_i32_0 = arith.constant 0 : i32
    %c0_i32_1 = arith.constant 0 : i32
    return %c0_i32, %c0_i32_0 : i32, i32
  }
  func.func @transform_2(%arg0: i32) -> (i32, i32) {
    %c0_i32 = arith.constant 0 : i32
    %c0_i32_0 = arith.constant 0 : i32
    return %arg0, %c0_i32 : i32, i32
  }
}

</mosaic_0001>

<bundles_post_ra>
// kernel: tpu_custom_call.1
= control target key start
LH: loop header
LB: loop body
LE: loop exit
PB: predicated region body
PF: predicated region fallthrough
CT: control target
= control target key end

     0   :  { %7 = vsyncpa [#allocation3], 0  ;;  %s956_s0 = inlined_call_operand.hbm [shape: f32[24,256], index: 0, kind: input, shape index: {}]   ;;  %s957_s1 = inlined_call_operand.hbm [shape: f32[1,256], index: 1, kind: input, shape index: {}]   ;;  %s958_s2 = inlined_call_operand.vmem [shape: f32[24,1], index: 2, kind: output, shape index: {}]  }
   0x1   :  { %9 = vsyncpa [#allocation3 + $0x1], 0 }
   0x2   :  { %10 = vsyncpa [#allocation5], 0  ;;  %s785_s9 = smov 0   ;;  %s787_s10 = smov 0  }
   0x3   :  { %s789_s11 = smov 0   ;;  %s791_s12 = smov 0  }
   0x4 LB: > { %s804_s13 = sadd.s32 4294967295, %s732_s12   ;;  %s807_s14 = sadd.s32 1, %s732_s12   ;;  %s732_s12 = sphi %s791_s12, %s969_s12   ;;  %s728_s11 = sphi %s789_s11, %s968_s11   ;;  %s724_s10 = sphi %s787_s10, %s967_s10   ;;  %s720_s9 = sphi %s785_s9, %s966_s9  }
   0x5   : > { %s20_s15 = ssub.s32 %s732_s12, %s807_s14  ;;  %s23_s16 = sadd.s32 1, %s728_s11 }
   0x6   : > { %p21_p0 = scmp.eq.s32.totalorder %s20_s15, 0  ;;  %p30_p1 = scmp.ne.s32.totalorder %s728_s11, %s724_s10 }
   0x7   : > { %p31_p2 = scmp.eq.s32.totalorder %s732_s12, 0  ;;  %p36_p3 = scmp.ne.s32.totalorder %s724_s10, %s720_s9 }
   0x8   : > { %s817_s17 = scalar_select %p21_p0, %s728_s11, %s23_s16  }
   0x9   : > { %p819_p4 = por %p31_p2, %p30_p1  ;;  %p37_p5 = scmp.eq.s32.totalorder %s804_s13, 0 }
   0xa   : > { %p81_p6 = scmp.eq.s32.totalorder %s804_s13, 1  ;;  %p461_p7 = scmp.ge.s32.totalorder %s732_s12, 1 }
   0xb   : > { %p828_p8 = por %p37_p5, %p36_p3  ;;  %p94_p9 = scmp.lt.s32.totalorder %s732_s12, 3 }
   0xc   : > { %p833_p10 = por %p81_p6, %p30_p1  ;;  %s766_s22 = smov [#allocation4]  }
   0xd   : > { %s961_s19 = scalar_select %p828_p8, 1, 0 }
   0xe   : > { %s962_s20 = scalar_select %p833_p10, 1, 0 }
   0xf   : > { %p837_p11 = pnand %p461_p7, %p94_p9  ;;  %s107_s23 = sshll.u32 %s766_s22, 4  ;;  %s108_s23 = int_to_ptr.vmem [resolvable:$true] %s107_s23 }
  0x10   : > { %s621_s24 = scalar_lea.vmem %s108_s23, 32  ;;  %p629_p6 = scmp.lt.s32.totalorder %s108_s23, %s108_s23 }
  0x11   : > { %p505_p12 = pneg %p837_p11  ;;  %p622_p2 = scmp.ne.s32.totalorder %s108_s23, %s621_s24 }
  0x12   : > { %p630_p8 = scmp.lt.s32.totalorder %s621_s24, %s621_s24 }
  0x13   : > { %p506_p13 = pnand %p505_p12, %p37_p5 }
  0x14   : > { %p631_p10 = por %p630_p8, %p629_p6 }
  0x15   : > { %p612_p0 = pneg %p506_p13 }
  0x17   : > { %p624_p3 = pnand %p622_p2, %p612_p0 }
  0x19   : > { %p625_p1 = pneg %p624_p3 }
  0x1b   : > { %p632_p7 = pnand %p631_p10, %p625_p1 }
  0x1d   : > { %635 = shalt.err (!%p632_p7)
}
  0x1e   : > { %508 = dma.hbm_to_vmem [thread:$0]  (!%p506_p13), %s957_s1, 32, %s108_s23, [#allocation5]  }
  0x1f   : > { %p463_p9 = scmp.ge.s32.totalorder %s732_s12, 2 }
  0x21   : > { %114 = sbr.rel (%p463_p9) target bundleno = 70 (0x46), region = 20 }
  0x26   : > { %117 = sbr.rel (!%p819_p4) target bundleno = 70 (0x46), region = 24  ;;  %s118_s27 = sand.u32 (%p819_p4), 1, %s728_s11  }
  0x27   : > { %s465_s28 = sshll.u32 (%p819_p4), %s732_s12, 1  ;;  %s464_s29 = sshll.u32 (%p819_p4), %s118_s27, 5 }
  0x28   : > { %s124_s30 = ssub.s32 (%p819_p4), 3, %s465_s28  ;;  %s856_s5 = scalar_lea.sflag (%p819_p4), [#allocation3], %s118_s27 }
  0x29   : > { %p125_p12 = scmp.lt.s32.totalorder (%p819_p4), %s124_s30, 2  ;;  %s122_s6 = scalar_lea.vmem (%p819_p4), [#allocation2], %s464_s29 }
  0x2b   : > { %s971_s30 = smov (!%p125_p12, %s124_s30), 2 }
  0x2c   : > { %s853_s3 = sshll.u32 %s971_s30, 8 }
  0x2d   : > { %s130_s4 = ssub.s32 512, %s853_s3 }
  0x2e   : > { %131 = vsyncadd %s856_s5, %s130_s4  ;;  %p468_p4 = scmp.ne.s32.totalorder %s853_s3, 0  ;;  %s496_s7 = sshll.u32 %s732_s12, 9 }
  0x2f   : > { %s864_s15 = scalar_lea.hbm %s956_s0, %s496_s7  ;;  %s137_s16 = sshll.u32 %s122_s6, 4  ;;  %s866_s16 = int_to_ptr.vmem [resolvable:$true] %s137_s16 }
  0x30   : > { %s636_s18 = scalar_lea.hbm %s864_s15, %s853_s3  ;;  %s640_s12 = scalar_lea.hbm %s956_s0, 768 }
  0x31   : > { %p637_p8 = scmp.ne.s32.totalorder %s864_s15, %s636_s18  ;;  %p641_p0 = scmp.lt.s32.totalorder %s864_s15, %s956_s0 }
  0x32   : > { %p642_p2 = scmp.lt.s32.totalorder %s640_s12, %s636_s18 }
  0x33   : > { %p638_p10 = pnand %p637_p8, %p468_p4 }
  0x34   : > { %p643_p3 = por %p642_p2, %p641_p0 }
  0x35   : > { %p639_p13 = pneg %p638_p10 }
  0x37   : > { %p644_p1 = pnand %p643_p3, %p639_p13 }
  0x39   : > { %647 = shalt.err (!%p644_p1)
}
  0x3a   : > { %s648_s26 = scalar_lea.vmem %s866_s16, %s853_s3  ;;  %s767_s27 = smov [#allocation2]  }
  0x3b   : > { %p649_p6 = scmp.ne.s32.totalorder %s866_s16, %s648_s26  ;;  %s652_s28 = sshll.u32 %s767_s27, 4  ;;  %s653_s28 = int_to_ptr.vmem [resolvable:$false] %s652_s28 }
  0x3c   : > { %s654_s29 = scalar_lea.vmem %s653_s28, 1024  ;;  %p655_p12 = scmp.lt.s32.totalorder %s866_s16, %s653_s28 }
  0x3d   : > { %p650_p7 = pnand %p649_p6, %p468_p4  ;;  %p656_p8 = scmp.lt.s32.totalorder %s654_s29, %s648_s26 }
  0x3f   : > { %p651_p9 = pneg %p650_p7  ;;  %p657_p10 = por %p656_p8, %p655_p12 }
  0x41   : > { %p658_p0 = pnand %p657_p10, %p651_p9 }
  0x43   : > { %661 = shalt.err (!%p658_p0)
}
  0x44   : > { %s768_s30 = smov 256   ;;  %s769_s4 = smov 16  }
  0x45   : > { %143 = dma.hbm_to_vmem [thread:$0]  (%p468_p4), %s864_s15, %s853_s3, %s866_s16, %s856_s5, %s768_s30, %s768_s30, %s769_s4  }
  0x46 PF: > { %149 = sbr.rel (%p837_p11) target bundleno = 272 (0x110), region = 28  ;;  %s895_s6 = sand.u32 (!%p837_p11), 1, %s724_s10  }
  0x47   : > { %s474_s7 = sshll.u32 (!%p837_p11), %s895_s6, 5  ;;  %s152_s8 = scalar_lea.sflag (!%p837_p11), [#allocation3], %s895_s6 }
  0x48   : > { %s155_s9 = scalar_lea.vmem (!%p837_p11), [#allocation2], %s474_s7  ;;  %p964_p13 = scmp.ne.s32.totalorder (!%p837_p11), %s961_s19, 0 }
  0x4b   : > { %711 = dma.done.wait (%p964_p13), %s152_s8, 512  }
  0x4c   : > { %713 = vsyncadd (%p964_p13), %s152_s8, 4294966784 }
  0x4d   : > { %715 = dma.done.wait (%p37_p5), [#allocation5], 32  }
  0x4e   : > { %717 = vsyncadd (%p37_p5), [#allocation5], 4294967264  ;;  %v196_v0 = vlaneseq  ;;  %v190_v4 = vld [vmem:[%s155_s9] sm:$0xff]  ;;  %v191_v5 = vld [vmem:[%s155_s9 + $0x8] sm:$0xff]  ;;  %s476_s19 = sshll.u32 %s895_s6, 4  ;;  %vm216_vm0 = vcmask 7168  }
  0x4f   : > { %v194_v6 = vld [vmem:[#allocation4] sm:$0x3]  ;;  %v192_v9 = vld [vmem:[%s155_s9 + $0x10] sm:$0xff]  ;;  %v193_v10 = vld [vmem:[%s155_s9 + $0x18] sm:$0xff]  ;;  %s908_s21 = scalar_lea.vmem [#allocation6], %s476_s19   ;;  %p965_p5 = scmp.ne.s32.totalorder %s962_s20, 0 }
  0x50   : > { %v197_v1 = vshrl.u32 %v196_v0, 7  ;;  %s478_s3 = sshll.u32 (%p965_p5), %s804_s13, 1  ;;  %s497_s5 = sshll.u32 (%p965_p5), %s804_s13, 4 }
  0x51   : > { %s227_s15 = ssub.s32 (%p965_p5), 3, %s478_s3  ;;  %s919_s22 = scalar_lea.vmem (%p965_p5), %s958_s2, %s497_s5  }
  0x52   : > { %v198_v2 = vsub.s32 0, %v197_v1  ;;  %v202_v3 = vsub.s32 1, %v197_v1  ;;  %p228_p11 = scmp.lt.s32.totalorder (%p965_p5), %s227_s15, 2 }
  0x54   : > { %v199_v7 = vrot.slane %v194_v6, %v198_v2  ;;  %v203_v8 = vrot.slane %v194_v6, %v202_v3 }
  0x56   : > { %v206_v11 = vmul.f32 %v199_v7, %v190_v4  ;;  %v207_v12 = vmul.f32 %v203_v8, %v191_v5  ;;  %v208_v13 = vmul.f32 %v199_v7, %v192_v9  ;;  %v209_v14 = vmul.f32 %v203_v8, %v193_v10 }
  0x58   : > { %v210_v15 = vadd.f32 %v207_v12, %v206_v11  ;;  %v213_v16 = vadd.f32 %v209_v14, %v208_v13 }
  0x5a   : > { %211 = vadd.xlane.f32.xlu0 %v210_v15 }
  0x5e   : > { %214 = vadd.xlane.f32.xlu0 %v213_v16 }
  0xe3   : > { %v212_v17 = vpop.xlane.xlu0 %211 }
  0xe4   : > { %217 = vst.msk [vmem:[%s908_s21] sm:$0xff] %vm216_vm0, %v212_v17  ;;  %225 = sbr.rel (!%p965_p5) target bundleno = 272 (0x110), region = 40 }
  0xe7   : > { %v215_v18 = vpop.xlane.xlu0 %214 }
  0xe8   : > { %218 = vst.msk [vmem:[%s908_s21 + $0x8] sm:$0xff] %vm216_vm0, %v215_v18 }
  0xe9   : > { %s973_s15 = smov (!%p228_p11, %s227_s15), 2 }
  0xea   : > { %s479_s23 = sshll.u32 %s973_s15, 7 }
  0xeb   : > { %p482_p4 = scmp.eq.s32.totalorder %s479_s23, 0 }
  0xec   : > { %s925_s20 = sshrl.u32 (!%p482_p4), %s973_s15, 1 }
  0xed   : > { %236 = sbr.rel (%p482_p4) target bundleno = 272 (0x110), region = 44  ;;  %p483_p2 = scmp.le.s32.totalorder (!%p482_p4), %s925_s20, 0 }
  0xf2   : > { %404 = sbr.rel (%p483_p2) target bundleno = 255 (0xff), region = 126  ;;  %s734_s13 = smov (!%p483_p2), %s919_s22  }
  0xf3   : > { %s738_s12 = smov (!%p483_p2), %s908_s21   ;;  %s742_s24 = smov (!%p483_p2), 0  }
  0xf4   : > { %s746_s25 = smov (!%p483_p2), 0  }
  0xf7 LB: >> { %v301_v19 = vld [vmem:[%s740_s12] sm:$0xff]  ;;  %v303_v20 = vld [vmem:[%s740_s12 + $0x8] sm:$0xff]  ;;  %s305_s26 = sadd.s32 1, %s744_s24  ;;  %s295_s25 = sadd.s32 1, %s748_s25   ;;  %s748_s25 = sphi %s746_s25, %s295_s25   ;;  %s744_s24 = sphi %s742_s24, %s743_s24   ;;  %s740_s12 = sphi %s738_s12, %s310_s12   ;;  %s736_s13 = sphi %s734_s13, %s311_s13  }
  0xf8   : >> { %302 = vst [vmem:[%s736_s13] sm:$0xff] %v301_v19  ;;  %304 = vst [vmem:[%s736_s13 + $0x8] sm:$0xff] %v303_v20  ;;  %p306_p3 = scmp.ge.s32.totalorder %s305_s26, %s925_s20  ;;  %p294_p1 = scmp.ge.s32.totalorder %s295_s25, %s925_s20 }
  0xfa   : >> { %s975_s26 = smov (%p306_p3, %s305_s26), 0  ;;  %297 = sbr.rel (!%p294_p1) target bundleno = 247 (0xf7), region = 132 }
  0xfb   : >> { %s484_s27 = sshll.u32 %s975_s26, 4  ;;  %s743_s24 = smov %s975_s26  }
  0xfc   : >> { %s310_s12 = scalar_lea.vmem %s908_s21, %s484_s27 [#allocation6]   ;;  %s311_s13 = scalar_lea.vmem %s919_s22, %s484_s27  }
  0xff PF: > { %s935_s28 = sand.u32 1, %s973_s15   ;;  %s498_s29 = sshll.u32 %s925_s20, 4 }
 0x100   : > { %s316_s30 = scalar_lea.vmem %s908_s21, %s498_s29 [#allocation6]   ;;  %s318_s4 = scalar_lea.vmem %s919_s22, %s498_s29  }
 0x101   : > { %p489_p6 = scmp.le.s32.totalorder %s935_s28, 0 }
 0x102   : > { %s750_s6 = smov (!%p489_p6), %s318_s4   ;;  %s754_s7 = smov (!%p489_p6), %s316_s30  }
 0x103   : > { %418 = sbr.rel (%p489_p6) target bundleno = 272 (0x110), region = 137  ;;  %s758_s8 = smov (!%p489_p6), 0  }
 0x104   : > { %s762_s9 = smov (!%p489_p6), 0  }
 0x108 LB: >> { %v328_v21 = vld [vmem:[%s756_s7] sm:$0xff]  ;;  %s330_s19 = sadd.s32 1, %s760_s8  ;;  %s322_s9 = sadd.s32 1, %s764_s9   ;;  %s764_s9 = sphi %s762_s9, %s322_s9   ;;  %s760_s8 = sphi %s758_s8, %s759_s8   ;;  %s756_s7 = sphi %s754_s7, %s335_s7   ;;  %s752_s6 = sphi %s750_s6, %s336_s6  }
 0x109   : >> { %329 = vst [vmem:[%s752_s6] sm:$0xff] %v328_v21  ;;  %p331_p7 = scmp.ge.s32.totalorder %s330_s19, %s935_s28  ;;  %p321_p9 = scmp.ge.s32.totalorder %s322_s9, %s935_s28 }
 0x10b   : >> { %s977_s19 = smov (%p331_p7, %s330_s19), 0  ;;  %324 = sbr.rel (!%p321_p9) target bundleno = 264 (0x108), region = 143 }
 0x10c   : >> { %s490_s21 = sshll.u32 %s977_s19, 3  ;;  %s759_s8 = smov %s977_s19  }
 0x10d   : >> { %s335_s7 = scalar_lea.vmem %s316_s30, %s490_s21 [#allocation6]   ;;  %s336_s6 = scalar_lea.vmem %s318_s4, %s490_s21  }
 0x110 PF: > { %p13_p12 = scmp.ge.s32.totalorder %s807_s14, 4   ;;  %s966_s9 = smov %s724_s10 }
 0x111   : > { %s967_s10 = smov %s728_s11  ;;  %s968_s11 = smov %s817_s17 }
 0x112   : > { %s969_s12 = smov %s807_s14  ;;  %15 = sbr.rel (!%p13_p12) target bundleno = 4 (0x4), region = 154 }
 0x117   :  { %352 = vsyncpa [#allocation3], 1 }
 0x118   :  { %354 = vsyncpa [#allocation3 + $0x1], 1 }
 0x119   :  { %355 = vsyncpa [#allocation5], 1 }

</bundles_post_ra>
